<compile_context>
chip_gen: v6e
topology: v6e:2x2x1
jax: 0.10.0
libtpu: 0.0.40
codegen_flags: <defaults>
</compile_context>

<pallas_src>
import jax
import jax.numpy as jnp
from jax.experimental import pallas as pl
from jax.experimental.pallas import tpu as pltpu


_VMEM_LIMIT = 32 * 1024 * 1024  # safe scoped-VMEM budget on v5e/v6e/v7x


def _round_up(x, m):
    return (x + m - 1) // m * m


# --------------------------- tiled MXU matmul -------------------------------

def _matmul_kernel(a_ref, b_ref, o_ref, acc_ref):
    @pl.when(pl.program_id(2) == 0)
    def _init():
        acc_ref[...] = jnp.zeros_like(acc_ref)

    acc_ref[...] += jnp.dot(a_ref[...], b_ref[...],
                            preferred_element_type=jnp.float32)

    @pl.when(pl.program_id(2) == pl.num_programs(2) - 1)
    def _store():
        o_ref[...] = acc_ref[...]


def pallas_matmul(a, b):
    """(M,K) @ (K,N) -> (M,N) f32.  Operands cast to bf16; K is a pipelined
    reduction grid axis accumulating into an f32 VMEM scratch.  Dims are
    zero-padded to tile multiples (N padded to 128 for lane-dense stores)."""
    M, K = a.shape
    _, N = b.shape
    tm = min(256, _round_up(M, 8))
    tn = 128
    tk = min(512, _round_up(K, 128))
    Mp, Np, Kp = _round_up(M, tm), _round_up(N, tn), _round_up(K, tk)

    a_p = jnp.pad(a.astype(jnp.bfloat16), ((0, Mp - M), (0, Kp - K)))
    b_p = jnp.pad(b.astype(jnp.bfloat16), ((0, Kp - K), (0, Np - N)))

    out = pl.pallas_call(
        _matmul_kernel,
        out_shape=jax.ShapeDtypeStruct((Mp, Np), jnp.float32),
        grid=(Mp // tm, Np // tn, Kp // tk),
        in_specs=[pl.BlockSpec((tm, tk), lambda i, j, k: (i, k)),
                  pl.BlockSpec((tk, tn), lambda i, j, k: (k, j))],
        out_specs=pl.BlockSpec((tm, tn), lambda i, j, k: (i, j)),
        scratch_shapes=[pltpu.VMEM((tm, tn), jnp.float32)],
        compiler_params=pltpu.CompilerParams(
            dimension_semantics=("parallel", "parallel", "arbitrary"),
            vmem_limit_bytes=_VMEM_LIMIT),
        cost_estimate=pl.CostEstimate(
            flops=2 * Mp * Np * Kp,
            transcendentals=0,
            bytes_accessed=2 * (Mp * Kp + Kp * Np) + 4 * Mp * Np),
    )(a_p, b_p)
    return out[:M, :N]


# ------------------- fused InstanceNorm (+ReLU / +residual) -----------------

def _in_normalize(x, g, b):
    mean = jnp.mean(x, axis=1, keepdims=True)
    xc = x - mean
    var = jnp.mean(xc * xc, axis=1, keepdims=True)   # biased var (PyTorch IN)
    return xc * jax.lax.rsqrt(var + 1e-5) * g + b


def _in_pair_kernel(x_ref, g_ref, b_ref, o_ref, r_ref):
    y = _in_normalize(x_ref[...], g_ref[...], b_ref[...])
    o_ref[...] = y                       # IN output (feature-map parity)
    r_ref[...] = jnp.maximum(y, 0.0)     # fused ReLU output


def _in_relu_kernel(x_ref, g_ref, b_ref, o_ref):
    y = _in_normalize(x_ref[...], g_ref[...], b_ref[...])
    o_ref[...] = jnp.maximum(y, 0.0)


def _in_add_kernel(x_ref, g_ref, b_ref, res_ref, o_ref):
    y = _in_normalize(x_ref[...], g_ref[...], b_ref[...])
    o_ref[...] = res_ref[...] + y        # fused residual add


def _in_call(kernel, x, gamma, beta, residual=None, n_out=1):
    # TODO(synk): tile H*W with a running-sum reduction for large resolutions
    # instead of one whole-(H*W) block per batch element.
    N, H, W, C = x.shape
    HW = H * W
    x3 = x.reshape(N, HW, C)
    feat_spec = pl.BlockSpec((1, HW, C), lambda n: (n, 0, 0))
    par_spec = pl.BlockSpec((1, 1, C), lambda n: (0, 0, 0))
    inputs = [x3, gamma.reshape(1, 1, C), beta.reshape(1, 1, C)]
    in_specs = [feat_spec, par_spec, par_spec]
    if residual is not None:
        inputs.append(residual.reshape(N, HW, C))
        in_specs.append(pl.BlockSpec((1, HW, C), lambda n: (n, 0, 0)))
    n_feat = (1 if residual is None else 2) + n_out
    if n_out == 1:
        out_shape = jax.ShapeDtypeStruct((N, HW, C), jnp.float32)
        out_specs = pl.BlockSpec((1, HW, C), lambda n: (n, 0, 0))
    else:
        out_shape = tuple(jax.ShapeDtypeStruct((N, HW, C), jnp.float32)
                          for _ in range(n_out))
        out_specs = tuple(pl.BlockSpec((1, HW, C), lambda n: (n, 0, 0))
                          for _ in range(n_out))
    res = pl.pallas_call(
        kernel,
        out_shape=out_shape,
        grid=(N,),
        in_specs=in_specs,
        out_specs=out_specs,
        compiler_params=pltpu.CompilerParams(
            dimension_semantics=("parallel",),
            vmem_limit_bytes=_VMEM_LIMIT),
        cost_estimate=pl.CostEstimate(
            flops=10 * N * HW * C,
            transcendentals=N * C,
            bytes_accessed=4 * N * HW * C * n_feat),
    )(*inputs)
    if n_out == 1:
        return res.reshape(N, H, W, C)
    return tuple(r.reshape(N, H, W, C) for r in res)


def instance_norm_and_relu(x, gamma, beta):
    """Returns (IN(x), relu(IN(x))) — both kept as separate feature maps."""
    return _in_call(_in_pair_kernel, x, gamma, beta, n_out=2)


def instance_norm_relu(x, gamma, beta):
    """relu(IN(x)) only (resblock internal — not exposed as a feature map)."""
    return _in_call(_in_relu_kernel, x, gamma, beta, n_out=1)


def instance_norm_add(x, gamma, beta, residual):
    """residual + IN(x) (resblock tail, residual add fused in)."""
    return _in_call(_in_add_kernel, x, gamma, beta, residual=residual, n_out=1)


# ------------------------------- tanh (lane-dense) --------------------------

def _tanh_kernel(x_ref, o_ref):
    o_ref[...] = jnp.tanh(x_ref[...])


def tanh(x):
    shape, total = x.shape, x.size
    padded = _round_up(total, 8 * 128)
    flat = jnp.pad(x.reshape(-1), (0, padded - total))
    rows = padded // 128
    tr = 8
    for cand in (4096, 2048, 1024, 512, 256, 128, 64, 32, 16, 8):
        if rows % cand == 0:
            tr = cand
            break
    x2 = flat.reshape(rows, 128)
    y = pl.pallas_call(
        _tanh_kernel,
        out_shape=jax.ShapeDtypeStruct((rows, 128), x.dtype),
        grid=(rows // tr,),
        in_specs=[pl.BlockSpec((tr, 128), lambda i: (i, 0))],
        out_specs=pl.BlockSpec((tr, 128), lambda i: (i, 0)),
        compiler_params=pltpu.CompilerParams(
            dimension_semantics=("parallel",),
            vmem_limit_bytes=_VMEM_LIMIT),
        cost_estimate=pl.CostEstimate(
            flops=rows * 128, transcendentals=rows * 128,
            bytes_accessed=2 * 4 * rows * 128),
    )(x2)
    return y.reshape(-1)[:total].reshape(shape)


# -------------------------- conv glue (JAX side) ----------------------------

def _im2col(x, kh, kw, stride, pad):
    N, H, W, C = x.shape
    xp = jnp.pad(x, ((0, 0), (pad, pad), (pad, pad), (0, 0)))
    Ho = (H + 2 * pad - kh) // stride + 1
    Wo = (W + 2 * pad - kw) // stride + 1
    cols = []
    for i in range(kh):
        for j in range(kw):
            cols.append(xp[:, i:i + stride * Ho:stride,
                           j:j + stride * Wo:stride, :])
    patches = jnp.stack(cols, axis=3)                # (N, Ho, Wo, kh*kw, C)
    return patches.reshape(N * Ho * Wo, kh * kw * C), Ho, Wo


def conv2d(x, w, stride, pad):
    # x: NHWC; w: PyTorch Conv2d layout (Cout, Cin, KH, KW), bias=False.
    # Patches and weights are bf16; the matmul accumulates in f32.
    # TODO(synk): eliminate the HBM im2col by accumulating kh*kw shifted-window
    # matmuls inside the Pallas kernel (kernel-tap grid axis).
    Cout, Cin, KH, KW = w.shape
    N = x.shape[0]
    patches, Ho, Wo = _im2col(x.astype(jnp.bfloat16), KH, KW, stride, pad)
    w_mat = jnp.transpose(w, (2, 3, 1, 0)).reshape(KH * KW * Cin, Cout)
    y = pallas_matmul(patches, w_mat.astype(jnp.bfloat16))
    return y.reshape(N, Ho, Wo, Cout)


def conv_transpose2d(x, w, stride, pad):
    # PyTorch ConvTranspose2d weight layout (Cin, Cout, 4, 4), stride=2, pad=1,
    # via sub-pixel decomposition: one stride-1 2x2 conv per output phase
    # (a, b) in {0,1}^2.  No zero-dilated input -> ~4x fewer MXU FLOPs.
    Cin, Cout, KH, KW = w.shape
    assert stride == 2 and pad == 1 and KH == 4 and KW == 4, \
        "only the Generator's k=4/s=2/p=1 conv-transpose is supported"
    N, H, W, _ = x.shape
    xp = jnp.pad(x, ((0, 0), (1, 1), (1, 1), (0, 0)))
    phases = []
    for a in (0, 1):
        row = []
        for b in (0, 1):
            # w_ph[co, ci, di, dj] = w[ci, co, 3-a-2*di, 3-b-2*dj]
            w_ph = w[:, :, [3 - a, 1 - a], :][:, :, :, [3 - b, 1 - b]]
            w_ph = jnp.transpose(w_ph, (1, 0, 2, 3))          # (Cout, Cin, 2, 2)
            x_ph = xp[:, a:a + H + 1, b:b + W + 1, :]
            row.append(conv2d(x_ph, w_ph, stride=1, pad=0))   # (N, H, W, Cout)
        phases.append(row)
    row0 = jnp.stack(phases[0], axis=3)                       # (N, H, W, 2, Cout)
    row1 = jnp.stack(phases[1], axis=3)
    y = jnp.stack([row0, row1], axis=2)                       # (N, H, 2, W, 2, Cout)
    return y.reshape(N, 2 * H, 2 * W, Cout)


# ---------------------------- parameter setup -------------------------------

def _conv_w(key, cout, cin, k):
    fan_in = cin * k * k
    bound = 1.0 / (fan_in ** 0.5)
    return jax.random.uniform(key, (cout, cin, k, k), jnp.float32, -bound, bound)


def _convT_w(key, cin, cout, k):
    fan_in = cout * k * k
    bound = 1.0 / (fan_in ** 0.5)
    return jax.random.uniform(key, (cin, cout, k, k), jnp.float32, -bound, bound)


def init_generator(key, conv_dim=64, c_dim=5, repeat_num=6):
    keys = iter(jax.random.split(key, 6 + 2 * repeat_num))
    layers = []

    def ones(c):
        return jnp.ones((c,), jnp.float32)

    def zeros(c):
        return jnp.zeros((c,), jnp.float32)

    layers.append(dict(type='conv_in_relu',
                       w=_conv_w(next(keys), conv_dim, 3 + c_dim, 7),
                       gamma=ones(conv_dim), beta=zeros(conv_dim),
                       stride=1, pad=3))
    curr = conv_dim
    for _ in range(2):
        layers.append(dict(type='conv_in_relu',
                           w=_conv_w(next(keys), curr * 2, curr, 4),
                           gamma=ones(curr * 2), beta=zeros(curr * 2),
                           stride=2, pad=1))
        curr *= 2
    for _ in range(repeat_num):
        layers.append(dict(type='resblock',
                           w1=_conv_w(next(keys), curr, curr, 3),
                           g1=ones(curr), b1=zeros(curr),
                           w2=_conv_w(next(keys), curr, curr, 3),
                           g2=ones(curr), b2=zeros(curr)))
    for _ in range(2):
        layers.append(dict(type='convT_in_relu',
                           w=_convT_w(next(keys), curr, curr // 2, 4),
                           gamma=ones(curr // 2), beta=zeros(curr // 2),
                           stride=2, pad=1))
        curr //= 2
    layers.append(dict(type='conv_tanh', w=_conv_w(next(keys), 3, curr, 7),
                       stride=1, pad=3))
    return layers


# ------------------------------ forward pass --------------------------------

def generator_forward(layers, x_nchw, c):
    N, _, H, W = x_nchw.shape
    x = jnp.transpose(x_nchw, (0, 2, 3, 1))                       # NCHW -> NHWC
    c_map = jnp.broadcast_to(c[:, None, None, :], (N, H, W, c.shape[1]))
    x = jnp.concatenate([x, c_map], axis=-1)

    fmaps = []                                  # NHWC; transposed once at the end
    for layer in layers:
        t = layer['type']
        if t in ('conv_in_relu', 'convT_in_relu'):
            if t == 'conv_in_relu':
                y = conv2d(x, layer['w'], layer['stride'], layer['pad'])
            else:
                y = conv_transpose2d(x, layer['w'], layer['stride'], layer['pad'])
            y_in, y_relu = instance_norm_and_relu(y, layer['gamma'], layer['beta'])
            fmaps += [y, y_in, y_relu]
            x = y_relu
        elif t == 'resblock':
            h = conv2d(x, layer['w1'], 1, 1)
            h = instance_norm_relu(h, layer['g1'], layer['b1'])
            h = conv2d(h, layer['w2'], 1, 1)
            x = instance_norm_add(h, layer['g2'], layer['b2'], x)
            fmaps.append(x)
        elif t == 'conv_tanh':
            y = conv2d(x, layer['w'], layer['stride'], layer['pad'])
            x = tanh(y)
            fmaps += [y, x]
        else:
            raise ValueError(t)

    out = jnp.transpose(x, (0, 3, 1, 2))                          # NHWC -> NCHW
    feature_maps = [jnp.transpose(f, (0, 3, 1, 2)) for f in fmaps]
    return out, feature_maps


# ---------------------------------- main -------------------------------------

if __name__ == "__main__":
    key = jax.random.PRNGKey(0)
    k_x, k_c, k_p = jax.random.split(key, 3)

    conv_dim, c_dim, repeat_num = 8, 5, 2
    N, H, W = 2, 16, 16

    x = jax.random.normal(k_x, (N, 3, H, W), jnp.float32)
    c = jax.random.normal(k_c, (N, c_dim), jnp.float32)

    layers = init_generator(k_p, conv_dim=conv_dim, c_dim=c_dim,
                            repeat_num=repeat_num)

    out, fmaps = generator_forward(layers, x, c)
    out = jax.block_until_ready(out)
    for f in fmaps:
        jax.block_until_ready(f)

    assert out.shape == (N, 3, H, W)
    assert len(fmaps) == 3 + 2 * 3 + repeat_num + 2 * 3 + 2
    print("KERNEL_OK")
</pallas_src>

<mosaic_0001>
module attributes {stable_mosaic.version = 11 : i64} {
  func.func @_matmul_kernel(%arg0: i32, %arg1: i32, %arg2: i32, %arg3: memref<256x512xbf16, #tpu.memory_space<vmem>>, %arg4: memref<512x128xbf16, #tpu.memory_space<vmem>>, %arg5: memref<256x128xf32, #tpu.memory_space<vmem>>, %arg6: memref<256x128xf32, #tpu.memory_space<vmem>>) attributes {dimension_semantics = [#tpu.dimension_semantics<parallel>, #tpu.dimension_semantics<parallel>, #tpu.dimension_semantics<arbitrary>], iteration_bounds = array<i64: 2, 1, 1>, scalar_prefetch = 0 : i64, scratch_operands = 1 : i64, tpu.core_type = #tpu.core_type<tc>, window_params = [{transform_indices = @transform_0, window_bounds = array<i64: 256, 512>}, {transform_indices = @transform_1, window_bounds = array<i64: 512, 128>}, {transform_indices = @transform_2, window_bounds = array<i64: 256, 128>}]} {
    %c0_i32 = arith.constant 0 : i32
    %0 = arith.cmpi eq, %arg2, %c0_i32 : i32
    %1 = arith.extui %0 : i1 to i32
    %c0_i32_0 = arith.constant 0 : i32
    %2 = arith.cmpi ne, %1, %c0_i32_0 : i32
    scf.if %2 {
      %cst_10 = arith.constant 0.000000e+00 : f32
      %12 = vector.broadcast %cst_10 : f32 to vector<256x128xf32>
      %c0_11 = arith.constant 0 : index
      %c0_12 = arith.constant 0 : index
      %13 = vector.load %arg6[%c0_11, %c0_12] : memref<256x128xf32, #tpu.memory_space<vmem>>, vector<256x128xf32>
      tpu.vector_store %arg6[%c0_11, %c0_12], %12 {strides = array<i32>} : memref<256x128xf32, #tpu.memory_space<vmem>>, vector<256x128xf32>,
    } else {
    }
    %c0 = arith.constant 0 : index
    %c0_1 = arith.constant 0 : index
    %3 = vector.load %arg6[%c0, %c0_1] : memref<256x128xf32, #tpu.memory_space<vmem>>, vector<256x128xf32>
    %c0_2 = arith.constant 0 : index
    %c0_3 = arith.constant 0 : index
    %4 = vector.load %arg3[%c0_2, %c0_3] : memref<256x512xbf16, #tpu.memory_space<vmem>>, vector<256x512xbf16>
    %c0_4 = arith.constant 0 : index
    %c0_5 = arith.constant 0 : index
    %5 = vector.load %arg4[%c0_4, %c0_5] : memref<512x128xbf16, #tpu.memory_space<vmem>>, vector<512x128xbf16>
    %cst = arith.constant dense<0.000000e+00> : vector<256x128xf32>
    %6 = tpu.matmul %4, %5, %cst {dimension_numbers = #tpu.dot_dimension_numbers<[1], [0], [0], [1], [0, 0, 1, 1], [], []>} : vector<256x512xbf16>, vector<512x128xbf16>, vector<256x128xf32> -> vector<256x128xf32>
    %7 = arith.addf %3, %6 : vector<256x128xf32>
    %c0_6 = arith.constant 0 : index
    %c0_7 = arith.constant 0 : index
    %8 = vector.load %arg6[%c0_6, %c0_7] : memref<256x128xf32, #tpu.memory_space<vmem>>, vector<256x128xf32>
    tpu.vector_store %arg6[%c0_6, %c0_7], %7 {strides = array<i32>} : memref<256x128xf32, #tpu.memory_space<vmem>>, vector<256x128xf32>,
    %c0_i32_8 = arith.constant 0 : i32
    %9 = arith.cmpi eq, %arg2, %c0_i32_8 : i32
    %10 = arith.extui %9 : i1 to i32
    %c0_i32_9 = arith.constant 0 : i32
    %11 = arith.cmpi ne, %10, %c0_i32_9 : i32
    scf.if %11 {
      %c0_10 = arith.constant 0 : index
      %c0_11 = arith.constant 0 : index
      %12 = vector.load %arg6[%c0_10, %c0_11] : memref<256x128xf32, #tpu.memory_space<vmem>>, vector<256x128xf32>
      %c0_12 = arith.constant 0 : index
      %c0_13 = arith.constant 0 : index
      %13 = vector.load %arg5[%c0_12, %c0_13] : memref<256x128xf32, #tpu.memory_space<vmem>>, vector<256x128xf32>
      tpu.vector_store %arg5[%c0_12, %c0_13], %12 {strides = array<i32>} : memref<256x128xf32, #tpu.memory_space<vmem>>, vector<256x128xf32>,
    } else {
    }
    return
  }
  func.func @transform_0(%arg0: i32, %arg1: i32, %arg2: i32) -> (i32, i32) {
    %c0_i32 = arith.constant 0 : i32
    return %arg0, %arg2 : i32, i32
  }
  func.func @transform_1(%arg0: i32, %arg1: i32, %arg2: i32) -> (i32, i32) {
    %c0_i32 = arith.constant 0 : i32
    return %arg2, %arg1 : i32, i32
  }
  func.func @transform_2(%arg0: i32, %arg1: i32, %arg2: i32) -> (i32, i32) {
    %c0_i32 = arith.constant 0 : i32
    return %arg0, %arg1 : i32, i32
  }
}

</mosaic_0001>

<bundles_post_ra>
// kernel: tpu_custom_call.1
= control target key start
LH: loop header
LB: loop body
LE: loop exit
PB: predicated region body
PF: predicated region fallthrough
CT: control target
= control target key end

     0   :  { %7 = vsyncpa [#allocation4], 0  ;;  %s2493_s0 = inlined_call_operand.hbm [shape: bf16[512,512], index: 0, kind: input, shape index: {}]   ;;  %s2494_s1 = inlined_call_operand.hbm [shape: bf16[512,128], index: 1, kind: input, shape index: {}]   ;;  %s2495_s2 = inlined_call_operand.hbm [shape: f32[512,128], index: 2, kind: output, shape index: {}]  }
   0x1   :  { %9 = vsyncpa [#allocation4 + $0x1], 0 }
   0x2   :  { %10 = vsyncpa [#allocation7], 0 }
   0x3   :  { %11 = vsyncpa [#allocation5], 0 }
   0x4   :  { %13 = vsyncpa [#allocation5 + $0x1], 0  ;;  %s2210_s9 = smov 0   ;;  %s2212_s10 = smov 0  }
   0x5   :  { %s2214_s11 = smov 0   ;;  %s2216_s12 = smov 0  }
   0x6   :  { %s2218_s13 = smov 0   ;;  %s2220_s14 = smov 0  }
   0x7 LB: > { %s1498_s15 = sadd.s32 4294967295, %s2184_s14   ;;  %s1499_s16 = sadd.s32 4294967294, %s2184_s14   ;;  %s2184_s14 = sphi %s2220_s14, %s19_s14   ;;  %s2180_s13 = sphi %s2218_s13, %s2513_s13   ;;  %s2176_s12 = sphi %s2216_s12, %s2512_s12   ;;  %s2172_s11 = sphi %s2214_s11, %s2511_s11   ;;  %s2168_s10 = sphi %s2212_s10, %s2510_s10   ;;  %s2164_s9 = sphi %s2210_s9, %s2509_s9  }
   0x8   : > { %p60_p0 = scmp.ne.s32.totalorder %s2168_s10, %s2164_s9  ;;  %p2244_p1 = scmp.eq.s32.totalorder %s1498_s15, 0 }
   0x9   : > { %p2248_p2 = scmp.eq.s32.totalorder %s1498_s15, 1  ;;  %p120_p3 = scmp.eq.s32.totalorder %s1499_s16, 1 }
   0xa   : > { %p2254_p4 = por %p2244_p1, %p60_p0  ;;  %p1500_p5 = scmp.ge.s32.totalorder %s2184_s14, 1 }
   0xb   : > { %p2259_p6 = por %p120_p3, %p60_p0  ;;  %p127_p7 = scmp.lt.s32.totalorder %s2184_s14, 3 }
   0xc   : > { %s2499_s19 = scalar_select %p2254_p4, 1, 0 }
   0xd   : > { %s2500_s20 = scalar_select %p2259_p6, 1, 0 }
   0xe   : > { %p2264_p8 = pnand %p1500_p5, %p127_p7  ;;  %s2186_s22 = smov [#allocation6]  }
   0xf   : > { %s143_s23 = sshll.u32 %s2186_s22, 4  ;;  %s38_s25 = sadd.s32 1, %s2180_s13  ;;  %s144_s23 = int_to_ptr.vmem [resolvable:$true] %s143_s23 }
  0x10   : > { %p1847_p9 = pneg %p2264_p8  ;;  %s2057_s26 = scalar_lea.vmem %s144_s23, 4096 }
  0x11   : > { %p2058_p13 = scmp.ne.s32.totalorder %s144_s23, %s2057_s26  ;;  %p2065_p5 = scmp.lt.s32.totalorder %s144_s23, %s144_s23 }
  0x12   : > { %p2273_p11 = pnand %p1847_p9, %p2244_p1  ;;  %p2066_p7 = scmp.lt.s32.totalorder %s2057_s26, %s2057_s26 }
  0x14   : > { %p2048_p12 = pneg %p2273_p11  ;;  %p2067_p6 = por %p2066_p7, %p2065_p5 }
  0x16   : > { %p2060_p0 = pnand %p2058_p13, %p2048_p12 }
  0x18   : > { %p2061_p3 = pneg %p2060_p0 }
  0x1a   : > { %p2068_p4 = pnand %p2067_p6, %p2061_p3 }
  0x1c   : > { %2071 = shalt.err (!%p2068_p4)
}
  0x1d   : > { %s2187_s27 = smov 64   ;;  %s2188_s28 = smov 4  }
  0x1e   : > { %1850 = dma.hbm_to_vmem [thread:$0]  (!%p2273_p11), %s2494_s1, 4096, %s144_s23, [#allocation7], %s2187_s27, %s2187_s27, %s2188_s28  }
  0x1f   : > { %p40_p6 = scmp.ge.s32.totalorder %s38_s25, 2  ;;  %s47_s3 = sadd.s32 1, %s2172_s11 }
  0x20   : > { %p54_p4 = scmp.ne.s32.totalorder %s2172_s11, %s2168_s10  ;;  %p55_p9 = scmp.eq.s32.totalorder %s2184_s14, 0 }
  0x21   : > { %s2515_s25 = smov (%p40_p6, %s38_s25), 0  ;;  %p1860_p0 = scmp.lt.s32.totalorder %s2184_s14, 2 }
  0x22   : > { %p2291_p12 = por %p55_p9, %p54_p4  ;;  %p2297_p13 = por %p2248_p2, %p54_p4 }
  0x23   : > { %s42_s6 = ssub.s32 %s2180_s13, %s2515_s25  ;;  %s157_s7 = sand.u32 1, %s2172_s11  }
  0x24   : > { %p45_p11 = scmp.eq.s32.totalorder %s42_s6, 0  ;;  %s1503_s8 = sshll.u32 %s157_s7, 9 }
  0x25   : > { %s1613_s16 = sshll.u32 %s2180_s13, 13  ;;  %s161_s26 = scalar_lea.vmem [#allocation3], %s1503_s8 }
  0x26   : > { %s2306_s15 = scalar_select %p45_p11, %s2172_s11, %s47_s3  }
  0x27   : > { %s170_s24 = scalar_lea.hbm %s2493_s0, %s1613_s16  ;;  %s171_s27 = sshll.u32 %s161_s26, 4  ;;  %s172_s27 = int_to_ptr.vmem [resolvable:$true] %s171_s27 }
  0x28   : > { %p2314_p2 = pnand %p1860_p0, %p2291_p12  ;;  %s158_s28 = scalar_lea.sflag [#allocation4], %s157_s7 }
  0x29   : > { %s2085_s29 = scalar_lea.vmem %s172_s27, 8192  ;;  %s2189_s30 = smov [#allocation3]  }
  0x2a   : > { %p2074_p3 = pneg %p2314_p2  ;;  %p2086_p5 = scmp.ne.s32.totalorder %s172_s27, %s2085_s29 }
  0x2b   : > { %s2090_s3 = sshll.u32 %s2189_s30, 4  ;;  %s2091_s3 = int_to_ptr.vmem [resolvable:$false] %s2090_s3 }
  0x2c   : > { %p2088_p7 = pnand %p2086_p5, %p2074_p3  ;;  %s2092_s6 = scalar_lea.vmem %s2091_s3, 16384 }
  0x2d   : > { %p2093_p4 = scmp.lt.s32.totalorder %s172_s27, %s2091_s3  ;;  %p2094_p9 = scmp.lt.s32.totalorder %s2092_s6, %s2085_s29 }
  0x2e   : > { %p2089_p6 = pneg %p2088_p7 }
  0x2f   : > { %p2095_p11 = por %p2094_p9, %p2093_p4 }
  0x31   : > { %p2096_p10 = pnand %p2095_p11, %p2089_p6 }
  0x33   : > { %2099 = shalt.err (!%p2096_p10)
}
  0x34   : > { %s2190_s4 = smov 256   ;;  %s2191_s8 = smov 16  }
  0x35   : > { %1854 = dma.hbm_to_vmem [thread:$0]  (!%p2314_p2), %s170_s24, 8192, %s172_s27, %s158_s28, %s2190_s4, %s2190_s4, %s2191_s8  }
  0x36   : > { %183 = sbr.rel (%p2264_p8) target bundleno = 434 (0x1b2), region = 28  ;;  %s2325_s7 = sand.u32 (!%p2264_p8), 1, %s2168_s10  }
  0x37   : > { %s1508_s16 = sshll.u32 (!%p2264_p8), %s2325_s7, 9  ;;  %s186_s22 = scalar_lea.sflag (!%p2264_p8), [#allocation4], %s2325_s7 }
  0x38   : > { %s2329_s23 = scalar_lea.vmem (!%p2264_p8), [#allocation3], %s1508_s16  ;;  %p2506_p12 = scmp.ne.s32.totalorder (!%p2264_p8), %s2499_s19, 0 }
  0x3b   : > { %2151 = dma.done.wait (%p2506_p12), %s186_s22, 8192  }
  0x3c   : > { %2153 = vsyncadd (%p2506_p12), %s186_s22, 4294959104 }
  0x3d   : > { %2155 = dma.done.wait (%p2244_p1), [#allocation7], 4096  }
  0x3e   : > { %2157 = vsyncadd (%p2244_p1), [#allocation7], 4294963200  ;;  %v1918_v0 = vld [vmem:[#allocation6 + $0x78] sm:$0xff]   ;;  %v1922_v4 = vld [vmem:[#allocation6 + $0x70] sm:$0xff]   ;;  %s1510_s17 = sshll.u32 %s2325_s7, 8  ;;  %s1614_s21 = sshll.u32 %s2176_s12, 12 }
  0x3f   : > { %v1919_v1 = vld [vmem:[#allocation6 + $0xf8] sm:$0xff]   ;;  %1615 = vmatprep.subr.bf16.mxu0 %v1918_v0  ;;  %v1923_v5 = vld [vmem:[#allocation6 + $0xf0] sm:$0xff]   ;;  %v1926_v8 = vld [vmem:[#allocation6 + $0x68] sm:$0xff]   ;;  %s2404_s19 = scalar_lea.vmem [#allocation8], %s1510_s17  ;;  %s2442_s18 = scalar_lea.hbm %s2495_s2, %s1614_s21 }
  0x40   : > { %v1920_v2 = vld [vmem:[#allocation6 + $0x38] sm:$0xff]   ;;  %1727 = vmatprep.subr.bf16.mxu1 %v1919_v1  ;;  %v1924_v6 = vld [vmem:[#allocation6 + $0x30] sm:$0xff]   ;;  %v1927_v9 = vld [vmem:[#allocation6 + $0xe8] sm:$0xff]   ;;  %s1395_s24 = sshll.u32 %s2404_s19, 4  ;;  %s1381_s28 = scalar_lea.sflag [#allocation5], %s2325_s7  ;;  %s2444_s24 = int_to_ptr.vmem [resolvable:$true] %s1395_s24 }
  0x41   : > { %v1921_v3 = vld [vmem:[#allocation6 + $0xb8] sm:$0xff]   ;;  %1616 = vmatpush3.bf16.msra.mxu0 %v1920_v2  ;;  %v1925_v7 = vld [vmem:[#allocation6 + $0xb0] sm:$0xff]   ;;  %v1928_v10 = vld [vmem:[#allocation6 + $0x28] sm:$0xff]   ;;  %s2100_s29 = scalar_lea.vmem %s2444_s24, 4096  ;;  %s2192_s12 = smov [#allocation8]  }
  0x42   : > { %1728 = vmatpush3.bf16.msra.mxu1 %v1921_v3  ;;  %1617 = vmatprep.subr.bf16.mxu0 %v1922_v4  ;;  %v1929_v11 = vld [vmem:[#allocation6 + $0xa8] sm:$0xff]   ;;  %v1930_v12 = vld [vmem:[#allocation6 + $0x60] sm:$0xff]   ;;  %v1934_v16 = vld [vmem:[#allocation6 + $0x58] sm:$0xff]   ;;  %p2101_p1 = scmp.ne.s32.totalorder %s2444_s24, %s2100_s29  ;;  %s2104_s30 = sshll.u32 %s2192_s12, 4  ;;  %s2105_s30 = int_to_ptr.vmem [resolvable:$false] %s2104_s30 }
  0x43   : > { %1729 = vmatprep.subr.bf16.mxu1 %v1923_v5  ;;  %v1931_v13 = vld [vmem:[#allocation6 + $0xe0] sm:$0xff]   ;;  %v1935_v17 = vld [vmem:[#allocation6 + $0xd8] sm:$0xff]   ;;  %v1938_v20 = vld [vmem:[#allocation6 + $0x50] sm:$0xff]   ;;  %s2106_s3 = scalar_lea.vmem %s2105_s30, 8192  ;;  %p2107_p0 = scmp.lt.s32.totalorder %s2444_s24, %s2105_s30 }
  0x44   : > { %v1932_v14 = vld [vmem:[#allocation6 + $0x20] sm:$0xff]   ;;  %v1936_v18 = vld [vmem:[#allocation6 + $0x18] sm:$0xff]   ;;  %v1939_v21 = vld [vmem:[#allocation6 + $0xd0] sm:$0xff]   ;;  %p2102_p8 = pnand %p2101_p1, %p2297_p13  ;;  %p2108_p2 = scmp.lt.s32.totalorder %s2106_s3, %s2100_s29 }
  0x45   : > { %1618 = vmatpush3.bf16.msra.mxu0 %v1924_v6  ;;  %v1933_v15 = vld [vmem:[#allocation6 + $0xa0] sm:$0xff]   ;;  %v1937_v19 = vld [vmem:[#allocation6 + $0x98] sm:$0xff]   ;;  %v1940_v22 = vld [vmem:[#allocation6 + $0x10] sm:$0xff]  }
  0x46   : > { %1730 = vmatpush3.bf16.msra.mxu1 %v1925_v7  ;;  %1619 = vmatprep.subr.bf16.mxu0 %v1926_v8  ;;  %v1941_v23 = vld [vmem:[#allocation6 + $0x90] sm:$0xff]   ;;  %v1942_v24 = vld [vmem:[#allocation6 + $0x48] sm:$0xff]   ;;  %v1946_v28 = vld [vmem:[#allocation6 + $0x40] sm:$0xff]   ;;  %p2103_p10 = pneg %p2102_p8  ;;  %p2109_p3 = por %p2108_p2, %p2107_p0 }
  0x47   : > { %1731 = vmatprep.subr.bf16.mxu1 %v1927_v9  ;;  %v1943_v25 = vld [vmem:[#allocation6 + $0xc8] sm:$0xff]   ;;  %v1947_v29 = vld [vmem:[#allocation6 + $0xc0] sm:$0xff]  }
  0x48   : > { %v1944_v26 = vld [vmem:[#allocation6 + $0x8] sm:$0xff]   ;;  %v1948_v30 = vld [vmem:[#allocation6] sm:$0xff]   ;;  %p2110_p5 = pnand %p2109_p3, %p2103_p10 }
  0x49   : > { %1620 = vmatpush3.bf16.msra.mxu0 %v1928_v10  ;;  %v1945_v27 = vld [vmem:[#allocation6 + $0x88] sm:$0xff]   ;;  %v1949_v31 = vld [vmem:[#allocation6 + $0x80] sm:$0xff]  }
  0x4a   : > { %1732 = vmatpush3.bf16.msra.mxu1 %v1929_v11  ;;  %1621 = vmatprep.subr.bf16.mxu0 %v1930_v12  ;;  %v1950_v32 = vld [vmem:[%s2329_s23] ss:$16 sps:$4 sm:$0xff]   ;;  %v1952_v33 = vld [vmem:[%s2329_s23 + $0x4] ss:$16 sps:$4 sm:$0xff]   ;;  %v1953_v34 = vld [vmem:[%s2329_s23 + $0x8] ss:$16 sps:$4 sm:$0xff]  }
  0x4b   : > { %1733 = vmatprep.subr.bf16.mxu1 %v1931_v13  ;;  %v1955_v35 = vld [vmem:[%s2329_s23 + $0xc] ss:$16 sps:$4 sm:$0xff]   ;;  %959 = vmatprep.mubr.bf16.mxu0 %v1952_v33  ;;  %v1956_v36 = vld [vmem:[%s2329_s23 + $0x24] ss:$16 sps:$4 sm:$0xff]   ;;  %v1960_v38 = vld [vmem:[%s2329_s23 + $0x20] ss:$16 sps:$4 sm:$0xff]  }
  0x4c   : > { %1120 = vmatprep.mubr.bf16.mxu1 %v1955_v35  ;;  %v1958_v37 = vld [vmem:[%s2329_s23 + $0x2c] ss:$16 sps:$4 sm:$0xff]   ;;  %v1961_v39 = vld [vmem:[%s2329_s23 + $0x28] ss:$16 sps:$4 sm:$0xff]   ;;  %v1962_v40 = vld [vmem:[%s2329_s23 + $0x44] ss:$16 sps:$4 sm:$0xff]  }
  0x4d   : > { %1622 = vmatpush3.bf16.msra.mxu0 %v1932_v14  ;;  %v1964_v41 = vld [vmem:[%s2329_s23 + $0x4c] ss:$16 sps:$4 sm:$0xff]   ;;  %v1966_v42 = vld [vmem:[%s2329_s23 + $0x40] ss:$16 sps:$4 sm:$0xff]   ;;  %v1967_v43 = vld [vmem:[%s2329_s23 + $0x48] ss:$16 sps:$4 sm:$0xff]  }
  0x4e   : > { %1734 = vmatpush3.bf16.msra.mxu1 %v1933_v15  ;;  %1623 = vmatprep.subr.bf16.mxu0 %v1934_v16  ;;  %v1968_v44 = vld [vmem:[%s2329_s23 + $0x64] ss:$16 sps:$4 sm:$0xff]   ;;  %v1970_v45 = vld [vmem:[%s2329_s23 + $0x6c] ss:$16 sps:$4 sm:$0xff]   ;;  %v1972_v46 = vld [vmem:[%s2329_s23 + $0x60] ss:$16 sps:$4 sm:$0xff]  }
  0x4f   : > { %1735 = vmatprep.subr.bf16.mxu1 %v1935_v17  ;;  %v1973_v47 = vld [vmem:[%s2329_s23 + $0x68] ss:$16 sps:$4 sm:$0xff]   ;;  %v1974_v48 = vld [vmem:[%s2329_s23 + $0x84] ss:$16 sps:$4 sm:$0xff]   ;;  %v1976_v49 = vld [vmem:[%s2329_s23 + $0x8c] ss:$16 sps:$4 sm:$0xff]  }
  0x50   : > { %v1978_v50 = vld [vmem:[%s2329_s23 + $0x80] ss:$16 sps:$4 sm:$0xff]   ;;  %v1979_v51 = vld [vmem:[%s2329_s23 + $0x88] ss:$16 sps:$4 sm:$0xff]   ;;  %v1980_v52 = vld [vmem:[%s2329_s23 + $0xa4] ss:$16 sps:$4 sm:$0xff]  }
  0x51   : > { %1624 = vmatpush3.bf16.msra.mxu0 %v1936_v18  ;;  %v1982_v53 = vld [vmem:[%s2329_s23 + $0xac] ss:$16 sps:$4 sm:$0xff]   ;;  %v1984_v54 = vld [vmem:[%s2329_s23 + $0xa0] ss:$16 sps:$4 sm:$0xff]   ;;  %v1985_v55 = vld [vmem:[%s2329_s23 + $0xa8] ss:$16 sps:$4 sm:$0xff]  }
  0x52   : > { %1736 = vmatpush3.bf16.msra.mxu1 %v1937_v19  ;;  %1625 = vmatprep.subr.bf16.mxu0 %v1938_v20  ;;  %v1986_v56 = vld [vmem:[%s2329_s23 + $0xc4] ss:$16 sps:$4 sm:$0xff]   ;;  %v1988_v57 = vld [vmem:[%s2329_s23 + $0xcc] ss:$16 sps:$4 sm:$0xff]   ;;  %v1990_v58 = vld [vmem:[%s2329_s23 + $0xc0] ss:$16 sps:$4 sm:$0xff]  }
  0x53   : > { %1737 = vmatprep.subr.bf16.mxu1 %v1939_v21  ;;  %v1991_v59 = vld [vmem:[%s2329_s23 + $0xc8] ss:$16 sps:$4 sm:$0xff]   ;;  %v1992_v60 = vld [vmem:[%s2329_s23 + $0xe4] ss:$16 sps:$4 sm:$0xff]   ;;  %v1994_v61 = vld [vmem:[%s2329_s23 + $0xec] ss:$16 sps:$4 sm:$0xff]  }
  0x54   : > { %v1996_v62 = vld [vmem:[%s2329_s23 + $0xe0] ss:$16 sps:$4 sm:$0xff]   ;;  %v1997_v63 = vld [vmem:[%s2329_s23 + $0xe8] ss:$16 sps:$4 sm:$0xff]   ;;  %v1998_v0 = vld [vmem:[%s2329_s23 + $0x104] ss:$16 sps:$4 sm:$0xff]  }
  0x55   : > { %1626 = vmatpush3.bf16.msra.mxu0 %v1940_v22  ;;  %v2000_v1 = vld [vmem:[%s2329_s23 + $0x10c] ss:$16 sps:$4 sm:$0xff]   ;;  %v2002_v2 = vld [vmem:[%s2329_s23 + $0x100] ss:$16 sps:$4 sm:$0xff]   ;;  %v2003_v3 = vld [vmem:[%s2329_s23 + $0x108] ss:$16 sps:$4 sm:$0xff]  }
  0x56   : > { %1738 = vmatpush3.bf16.msra.mxu1 %v1941_v23  ;;  %1627 = vmatprep.subr.bf16.mxu0 %v1942_v24  ;;  %v2004_v4 = vld [vmem:[%s2329_s23 + $0x124] ss:$16 sps:$4 sm:$0xff]   ;;  %v2006_v5 = vld [vmem:[%s2329_s23 + $0x12c] ss:$16 sps:$4 sm:$0xff]   ;;  %v2008_v6 = vld [vmem:[%s2329_s23 + $0x120] ss:$16 sps:$4 sm:$0xff]  }
  0x57   : > { %1739 = vmatprep.subr.bf16.mxu1 %v1943_v25  ;;  %v2009_v7 = vld [vmem:[%s2329_s23 + $0x128] ss:$16 sps:$4 sm:$0xff]   ;;  %v2010_v8 = vld [vmem:[%s2329_s23 + $0x144] ss:$16 sps:$4 sm:$0xff]   ;;  %v2012_v9 = vld [vmem:[%s2329_s23 + $0x14c] ss:$16 sps:$4 sm:$0xff]  }
  0x58   : > { %v2014_v10 = vld [vmem:[%s2329_s23 + $0x140] ss:$16 sps:$4 sm:$0xff]   ;;  %v2015_v11 = vld [vmem:[%s2329_s23 + $0x148] ss:$16 sps:$4 sm:$0xff]   ;;  %v2016_v12 = vld [vmem:[%s2329_s23 + $0x164] ss:$16 sps:$4 sm:$0xff]  }
  0x59   : > { %1628 = vmatpush3.bf16.msra.mxu0 %v1944_v26  ;;  %v2018_v13 = vld [vmem:[%s2329_s23 + $0x16c] ss:$16 sps:$4 sm:$0xff]   ;;  %v2020_v14 = vld [vmem:[%s2329_s23 + $0x160] ss:$16 sps:$4 sm:$0xff]   ;;  %v2021_v15 = vld [vmem:[%s2329_s23 + $0x168] ss:$16 sps:$4 sm:$0xff]  }
  0x5a   : > { %1740 = vmatpush3.bf16.msra.mxu1 %v1945_v27  ;;  %1629 = vmatprep.subr.bf16.mxu0 %v1946_v28  ;;  %v2022_v16 = vld [vmem:[%s2329_s23 + $0x184] ss:$16 sps:$4 sm:$0xff]   ;;  %v2024_v17 = vld [vmem:[%s2329_s23 + $0x18c] ss:$16 sps:$4 sm:$0xff]   ;;  %v2026_v18 = vld [vmem:[%s2329_s23 + $0x180] ss:$16 sps:$4 sm:$0xff]  }
  0x5b   : > { %1741 = vmatprep.subr.bf16.mxu1 %v1947_v29  ;;  %v2027_v19 = vld [vmem:[%s2329_s23 + $0x188] ss:$16 sps:$4 sm:$0xff]   ;;  %v2028_v20 = vld [vmem:[%s2329_s23 + $0x1a4] ss:$16 sps:$4 sm:$0xff]   ;;  %v2030_v21 = vld [vmem:[%s2329_s23 + $0x1ac] ss:$16 sps:$4 sm:$0xff]  }
  0x5c   : > { %v2032_v22 = vld [vmem:[%s2329_s23 + $0x1a0] ss:$16 sps:$4 sm:$0xff]   ;;  %v2033_v23 = vld [vmem:[%s2329_s23 + $0x1a8] ss:$16 sps:$4 sm:$0xff]   ;;  %v2034_v24 = vld [vmem:[%s2329_s23 + $0x1c4] ss:$16 sps:$4 sm:$0xff]  }
  0x5d   : > { %1630 = vmatpush3.bf16.msra.mxu0 %v1948_v30  ;;  %v2036_v25 = vld [vmem:[%s2329_s23 + $0x1cc] ss:$16 sps:$4 sm:$0xff]   ;;  %v2038_v26 = vld [vmem:[%s2329_s23 + $0x1c0] ss:$16 sps:$4 sm:$0xff]   ;;  %v2039_v27 = vld [vmem:[%s2329_s23 + $0x1c8] ss:$16 sps:$4 sm:$0xff]  }
  0x5e   : > { %1742 = vmatpush3.bf16.msra.mxu1 %v1949_v31  ;;  %v2040_v28 = vld [vmem:[%s2329_s23 + $0x1e4] ss:$16 sps:$4 sm:$0xff]   ;;  %v2042_v29 = vld [vmem:[%s2329_s23 + $0x1ec] ss:$16 sps:$4 sm:$0xff]   ;;  %v2044_v30 = vld [vmem:[%s2329_s23 + $0x1e0] ss:$16 sps:$4 sm:$0xff]  }
  0x5f   : > { %v2045_v31 = vld [vmem:[%s2329_s23 + $0x1e8] ss:$16 sps:$4 sm:$0xff]  }
  0x60   : > { %960 = vmatmul.mubr.bf16.vlgmr.msra.gmra.mxu0 %v1950_v32 }
  0x61   : > { %1121 = vmatmul.mubr.bf16.vlgmr.msra.gmra.mxu1 %v1953_v34  ;;  %967 = vmatprep.mubr.bf16.mxu0 %v1956_v36 }
  0x62   : > { %1128 = vmatprep.mubr.bf16.mxu1 %v1958_v37 }
  0x68   : > { %968 = vmatmul.mubr.bf16.gmra.mxu0 %v1960_v38 }
  0x69   : > { %1129 = vmatmul.mubr.bf16.gmra.mxu1 %v1961_v39  ;;  %975 = vmatprep.mubr.bf16.mxu0 %v1962_v40 }
  0x6a   : > { %1136 = vmatprep.mubr.bf16.mxu1 %v1964_v41 }
  0x70   : > { %976 = vmatmul.mubr.bf16.gmra.mxu0 %v1966_v42 }
  0x71   : > { %1137 = vmatmul.mubr.bf16.gmra.mxu1 %v1967_v43  ;;  %983 = vmatprep.mubr.bf16.mxu0 %v1968_v44 }
  0x72   : > { %1144 = vmatprep.mubr.bf16.mxu1 %v1970_v45 }
  0x78   : > { %984 = vmatmul.mubr.bf16.gmra.mxu0 %v1972_v46 }
  0x79   : > { %1145 = vmatmul.mubr.bf16.gmra.mxu1 %v1973_v47  ;;  %991 = vmatprep.mubr.bf16.mxu0 %v1974_v48 }
  0x7a   : > { %1152 = vmatprep.mubr.bf16.mxu1 %v1976_v49 }
  0x80   : > { %992 = vmatmul.mubr.bf16.gmra.mxu0 %v1978_v50 }
  0x81   : > { %1153 = vmatmul.mubr.bf16.gmra.mxu1 %v1979_v51  ;;  %999 = vmatprep.mubr.bf16.mxu0 %v1980_v52 }
  0x82   : > { %1160 = vmatprep.mubr.bf16.mxu1 %v1982_v53 }
  0x88   : > { %1000 = vmatmul.mubr.bf16.gmra.mxu0 %v1984_v54 }
  0x89   : > { %1161 = vmatmul.mubr.bf16.gmra.mxu1 %v1985_v55  ;;  %1007 = vmatprep.mubr.bf16.mxu0 %v1986_v56 }
  0x8a   : > { %1168 = vmatprep.mubr.bf16.mxu1 %v1988_v57 }
  0x90   : > { %1008 = vmatmul.mubr.bf16.gmra.mxu0 %v1990_v58 }
  0x91   : > { %1169 = vmatmul.mubr.bf16.gmra.mxu1 %v1991_v59  ;;  %1015 = vmatprep.mubr.bf16.mxu0 %v1992_v60 }
  0x92   : > { %1176 = vmatprep.mubr.bf16.mxu1 %v1994_v61 }
  0x98   : > { %1016 = vmatmul.mubr.bf16.gmra.mxu0 %v1996_v62 }
  0x99   : > { %1177 = vmatmul.mubr.bf16.gmra.mxu1 %v1997_v63  ;;  %1023 = vmatprep.mubr.bf16.mxu0 %v1998_v0 }
  0x9a   : > { %1184 = vmatprep.mubr.bf16.mxu1 %v2000_v1 }
  0xa0   : > { %1024 = vmatmul.mubr.bf16.gmra.mxu0 %v2002_v2 }
  0xa1   : > { %1185 = vmatmul.mubr.bf16.gmra.mxu1 %v2003_v3  ;;  %1031 = vmatprep.mubr.bf16.mxu0 %v2004_v4 }
  0xa2   : > { %1192 = vmatprep.mubr.bf16.mxu1 %v2006_v5 }
  0xa8   : > { %1032 = vmatmul.mubr.bf16.gmra.mxu0 %v2008_v6 }
  0xa9   : > { %1193 = vmatmul.mubr.bf16.gmra.mxu1 %v2009_v7  ;;  %1039 = vmatprep.mubr.bf16.mxu0 %v2010_v8 }
  0xaa   : > { %1200 = vmatprep.mubr.bf16.mxu1 %v2012_v9 }
  0xb0   : > { %1040 = vmatmul.mubr.bf16.gmra.mxu0 %v2014_v10 }
  0xb1   : > { %1201 = vmatmul.mubr.bf16.gmra.mxu1 %v2015_v11  ;;  %1047 = vmatprep.mubr.bf16.mxu0 %v2016_v12 }
  0xb2   : > { %1208 = vmatprep.mubr.bf16.mxu1 %v2018_v13 }
  0xb8   : > { %1048 = vmatmul.mubr.bf16.gmra.mxu0 %v2020_v14 }
  0xb9   : > { %1209 = vmatmul.mubr.bf16.gmra.mxu1 %v2021_v15  ;;  %1055 = vmatprep.mubr.bf16.mxu0 %v2022_v16 }
  0xba   : > { %1216 = vmatprep.mubr.bf16.mxu1 %v2024_v17 }
  0xc0   : > { %1056 = vmatmul.mubr.bf16.gmra.mxu0 %v2026_v18 }
  0xc1   : > { %1217 = vmatmul.mubr.bf16.gmra.mxu1 %v2027_v19  ;;  %1063 = vmatprep.mubr.bf16.mxu0 %v2028_v20 }
  0xc2   : > { %1224 = vmatprep.mubr.bf16.mxu1 %v2030_v21 }
  0xc8   : > { %1064 = vmatmul.mubr.bf16.gmra.mxu0 %v2032_v22 }
  0xc9   : > { %1225 = vmatmul.mubr.bf16.gmra.mxu1 %v2033_v23  ;;  %1071 = vmatprep.mubr.bf16.mxu0 %v2034_v24 }
  0xca   : > { %1232 = vmatprep.mubr.bf16.mxu1 %v2036_v25 }
  0xd0   : > { %1072 = vmatmul.mubr.bf16.gmra.mxu0 %v2038_v26 }
  0xd1   : > { %1233 = vmatmul.mubr.bf16.gmra.mxu1 %v2039_v27  ;;  %1079 = vmatprep.mubr.bf16.mxu0 %v2040_v28 }
  0xd2   : > { %1240 = vmatprep.mubr.bf16.mxu1 %v2042_v29 }
  0xd8   : > { %1080 = vmatmul.mubr.bf16.gmra.mxu0 %v2044_v30 }
  0xd9   : > { %1241 = vmatmul.mubr.bf16.gmra.mxu1 %v2045_v31 }
 0x120   : > { %v1631_v32 = vpop.f32.mrf.mxu0 }
 0x121   : > { %v1743_v33 = vpop.f32.mrf.mxu1 }
 0x122   : > { %v1632_v34 = vpop.f32.mrf.mxu0 }
 0x123   : > { %v1633_v35 = vadd.f32 %v1632_v34, %v1631_v32  ;;  %v1744_v36 = vpop.f32.mrf.mxu1 }
 0x124   : > { %v1745_v37 = vadd.f32 %v1744_v36, %v1743_v33  ;;  %v1634_v38 = vpop.f32.mrf.mxu0 }
 0x125   : > { %v1746_v39 = vpop.f32.mrf.mxu1 }
 0x126   : > { %v1123_v40 = vadd.f32 %v1745_v37, %v1633_v35  ;;  %v1635_v41 = vpop.f32.mrf.mxu0 }
 0x127   : > { %v1636_v42 = vadd.f32 %v1635_v41, %v1634_v38  ;;  %v1747_v43 = vpop.f32.mrf.mxu1 }
 0x128   : > { %1348 = vst [vmem:[%s2404_s19] sm:$0xff] %v1123_v40  ;;  %v1748_v44 = vadd.f32 %v1747_v43, %v1746_v39  ;;  %v1637_v45 = vpop.f32.mrf.mxu0 }
 0x129   : > { %v1749_v46 = vpop.f32.mrf.mxu1 }
 0x12a   : > { %v1126_v47 = vadd.f32 %v1748_v44, %v1636_v42  ;;  %v1638_v48 = vpop.f32.mrf.mxu0 }
 0x12b   : > { %v1639_v49 = vadd.f32 %v1638_v48, %v1637_v45  ;;  %v1750_v50 = vpop.f32.mrf.mxu1 }
 0x12c   : > { %1349 = vst [vmem:[%s2404_s19 + $0x8] sm:$0xff] %v1126_v47  ;;  %v1751_v51 = vadd.f32 %v1750_v50, %v1749_v46  ;;  %v1640_v52 = vpop.f32.mrf.mxu0 }
 0x12d   : > { %v1752_v53 = vpop.f32.mrf.mxu1 }
 0x12e   : > { %v1131_v54 = vadd.f32 %v1751_v51, %v1639_v49  ;;  %v1641_v55 = vpop.f32.mrf.mxu0 }
 0x12f   : > { %v1642_v56 = vadd.f32 %v1641_v55, %v1640_v52  ;;  %v1753_v57 = vpop.f32.mrf.mxu1 }
 0x130   : > { %1350 = vst [vmem:[%s2404_s19 + $0x10] sm:$0xff] %v1131_v54  ;;  %v1754_v58 = vadd.f32 %v1753_v57, %v1752_v53  ;;  %v1643_v59 = vpop.f32.mrf.mxu0 }
 0x131   : > { %v1755_v60 = vpop.f32.mrf.mxu1 }
 0x132   : > { %v1134_v61 = vadd.f32 %v1754_v58, %v1642_v56  ;;  %v1644_v62 = vpop.f32.mrf.mxu0 }
 0x133   : > { %v1645_v63 = vadd.f32 %v1644_v62, %v1643_v59  ;;  %v1756_v0 = vpop.f32.mrf.mxu1 }
 0x134   : > { %1351 = vst [vmem:[%s2404_s19 + $0x18] sm:$0xff] %v1134_v61  ;;  %v1757_v1 = vadd.f32 %v1756_v0, %v1755_v60  ;;  %v1646_v2 = vpop.f32.mrf.mxu0 }
 0x135   : > { %v1758_v3 = vpop.f32.mrf.mxu1 }
 0x136   : > { %v1139_v4 = vadd.f32 %v1757_v1, %v1645_v63  ;;  %v1647_v5 = vpop.f32.mrf.mxu0 }
 0x137   : > { %v1648_v6 = vadd.f32 %v1647_v5, %v1646_v2  ;;  %v1759_v7 = vpop.f32.mrf.mxu1 }
 0x138   : > { %1352 = vst [vmem:[%s2404_s19 + $0x20] sm:$0xff] %v1139_v4  ;;  %v1760_v8 = vadd.f32 %v1759_v7, %v1758_v3  ;;  %v1649_v9 = vpop.f32.mrf.mxu0 }
 0x139   : > { %v1761_v10 = vpop.f32.mrf.mxu1 }
 0x13a   : > { %v1142_v11 = vadd.f32 %v1760_v8, %v1648_v6  ;;  %v1650_v12 = vpop.f32.mrf.mxu0 }
 0x13b   : > { %v1651_v13 = vadd.f32 %v1650_v12, %v1649_v9  ;;  %v1762_v14 = vpop.f32.mrf.mxu1 }
 0x13c   : > { %1353 = vst [vmem:[%s2404_s19 + $0x28] sm:$0xff] %v1142_v11  ;;  %v1763_v15 = vadd.f32 %v1762_v14, %v1761_v10  ;;  %v1652_v16 = vpop.f32.mrf.mxu0 }
 0x13d   : > { %v1764_v17 = vpop.f32.mrf.mxu1 }
 0x13e   : > { %v1147_v18 = vadd.f32 %v1763_v15, %v1651_v13  ;;  %v1653_v19 = vpop.f32.mrf.mxu0 }
 0x13f   : > { %v1654_v20 = vadd.f32 %v1653_v19, %v1652_v16  ;;  %v1765_v21 = vpop.f32.mrf.mxu1 }
 0x140   : > { %1354 = vst [vmem:[%s2404_s19 + $0x30] sm:$0xff] %v1147_v18  ;;  %v1766_v22 = vadd.f32 %v1765_v21, %v1764_v17  ;;  %v1655_v23 = vpop.f32.mrf.mxu0 }
 0x141   : > { %v1767_v24 = vpop.f32.mrf.mxu1 }
 0x142   : > { %v1150_v25 = vadd.f32 %v1766_v22, %v1654_v20  ;;  %v1656_v26 = vpop.f32.mrf.mxu0 }
 0x143   : > { %v1657_v27 = vadd.f32 %v1656_v26, %v1655_v23  ;;  %v1768_v28 = vpop.f32.mrf.mxu1 }
 0x144   : > { %1355 = vst [vmem:[%s2404_s19 + $0x38] sm:$0xff] %v1150_v25  ;;  %v1769_v29 = vadd.f32 %v1768_v28, %v1767_v24  ;;  %v1658_v30 = vpop.f32.mrf.mxu0 }
 0x145   : > { %v1770_v31 = vpop.f32.mrf.mxu1 }
 0x146   : > { %v1155_v32 = vadd.f32 %v1769_v29, %v1657_v27  ;;  %v1659_v33 = vpop.f32.mrf.mxu0 }
 0x147   : > { %v1660_v34 = vadd.f32 %v1659_v33, %v1658_v30  ;;  %v1771_v35 = vpop.f32.mrf.mxu1 }
 0x148   : > { %1356 = vst [vmem:[%s2404_s19 + $0x40] sm:$0xff] %v1155_v32  ;;  %v1772_v36 = vadd.f32 %v1771_v35, %v1770_v31  ;;  %v1661_v37 = vpop.f32.mrf.mxu0 }
 0x149   : > { %v1773_v38 = vpop.f32.mrf.mxu1 }
 0x14a   : > { %v1158_v39 = vadd.f32 %v1772_v36, %v1660_v34  ;;  %v1662_v40 = vpop.f32.mrf.mxu0 }
 0x14b   : > { %v1663_v41 = vadd.f32 %v1662_v40, %v1661_v37  ;;  %v1774_v42 = vpop.f32.mrf.mxu1 }
 0x14c   : > { %1357 = vst [vmem:[%s2404_s19 + $0x48] sm:$0xff] %v1158_v39  ;;  %v1775_v43 = vadd.f32 %v1774_v42, %v1773_v38  ;;  %v1664_v44 = vpop.f32.mrf.mxu0 }
 0x14d   : > { %v1776_v45 = vpop.f32.mrf.mxu1 }
 0x14e   : > { %v1163_v46 = vadd.f32 %v1775_v43, %v1663_v41  ;;  %v1665_v47 = vpop.f32.mrf.mxu0 }
 0x14f   : > { %v1666_v48 = vadd.f32 %v1665_v47, %v1664_v44  ;;  %v1777_v49 = vpop.f32.mrf.mxu1 }
 0x150   : > { %1358 = vst [vmem:[%s2404_s19 + $0x50] sm:$0xff] %v1163_v46  ;;  %v1778_v50 = vadd.f32 %v1777_v49, %v1776_v45  ;;  %v1667_v51 = vpop.f32.mrf.mxu0 }
 0x151   : > { %v1779_v52 = vpop.f32.mrf.mxu1 }
 0x152   : > { %v1166_v53 = vadd.f32 %v1778_v50, %v1666_v48  ;;  %v1668_v54 = vpop.f32.mrf.mxu0 }
 0x153   : > { %v1669_v55 = vadd.f32 %v1668_v54, %v1667_v51  ;;  %v1780_v56 = vpop.f32.mrf.mxu1 }
 0x154   : > { %1359 = vst [vmem:[%s2404_s19 + $0x58] sm:$0xff] %v1166_v53  ;;  %v1781_v57 = vadd.f32 %v1780_v56, %v1779_v52  ;;  %v1670_v58 = vpop.f32.mrf.mxu0 }
 0x155   : > { %v1782_v59 = vpop.f32.mrf.mxu1 }
 0x156   : > { %v1171_v60 = vadd.f32 %v1781_v57, %v1669_v55  ;;  %v1671_v61 = vpop.f32.mrf.mxu0 }
 0x157   : > { %v1672_v62 = vadd.f32 %v1671_v61, %v1670_v58  ;;  %v1783_v63 = vpop.f32.mrf.mxu1 }
 0x158   : > { %1360 = vst [vmem:[%s2404_s19 + $0x60] sm:$0xff] %v1171_v60  ;;  %v1784_v0 = vadd.f32 %v1783_v63, %v1782_v59  ;;  %v1673_v1 = vpop.f32.mrf.mxu0 }
 0x159   : > { %v1785_v2 = vpop.f32.mrf.mxu1 }
 0x15a   : > { %v1174_v3 = vadd.f32 %v1784_v0, %v1672_v62  ;;  %v1674_v4 = vpop.f32.mrf.mxu0 }
 0x15b   : > { %v1675_v5 = vadd.f32 %v1674_v4, %v1673_v1  ;;  %v1786_v6 = vpop.f32.mrf.mxu1 }
 0x15c   : > { %1361 = vst [vmem:[%s2404_s19 + $0x68] sm:$0xff] %v1174_v3  ;;  %v1787_v7 = vadd.f32 %v1786_v6, %v1785_v2  ;;  %v1676_v8 = vpop.f32.mrf.mxu0 }
 0x15d   : > { %v1788_v9 = vpop.f32.mrf.mxu1 }
 0x15e   : > { %v1179_v10 = vadd.f32 %v1787_v7, %v1675_v5  ;;  %v1677_v11 = vpop.f32.mrf.mxu0 }
 0x15f   : > { %v1678_v12 = vadd.f32 %v1677_v11, %v1676_v8  ;;  %v1789_v13 = vpop.f32.mrf.mxu1 }
 0x160   : > { %1362 = vst [vmem:[%s2404_s19 + $0x70] sm:$0xff] %v1179_v10  ;;  %v1790_v14 = vadd.f32 %v1789_v13, %v1788_v9  ;;  %v1679_v15 = vpop.f32.mrf.mxu0 }
 0x161   : > { %v1791_v16 = vpop.f32.mrf.mxu1 }
 0x162   : > { %v1182_v17 = vadd.f32 %v1790_v14, %v1678_v12  ;;  %v1680_v18 = vpop.f32.mrf.mxu0 }
 0x163   : > { %v1681_v19 = vadd.f32 %v1680_v18, %v1679_v15  ;;  %v1792_v20 = vpop.f32.mrf.mxu1 }
 0x164   : > { %1363 = vst [vmem:[%s2404_s19 + $0x78] sm:$0xff] %v1182_v17  ;;  %v1793_v21 = vadd.f32 %v1792_v20, %v1791_v16  ;;  %v1682_v22 = vpop.f32.mrf.mxu0 }
 0x165   : > { %v1794_v23 = vpop.f32.mrf.mxu1 }
 0x166   : > { %v1187_v24 = vadd.f32 %v1793_v21, %v1681_v19  ;;  %v1683_v25 = vpop.f32.mrf.mxu0 }
 0x167   : > { %v1684_v26 = vadd.f32 %v1683_v25, %v1682_v22  ;;  %v1795_v27 = vpop.f32.mrf.mxu1 }
 0x168   : > { %1364 = vst [vmem:[%s2404_s19 + $0x80] sm:$0xff] %v1187_v24  ;;  %v1796_v28 = vadd.f32 %v1795_v27, %v1794_v23  ;;  %v1685_v29 = vpop.f32.mrf.mxu0 }
 0x169   : > { %v1797_v30 = vpop.f32.mrf.mxu1 }
 0x16a   : > { %v1190_v31 = vadd.f32 %v1796_v28, %v1684_v26  ;;  %v1686_v32 = vpop.f32.mrf.mxu0 }
 0x16b   : > { %v1687_v33 = vadd.f32 %v1686_v32, %v1685_v29  ;;  %v1798_v34 = vpop.f32.mrf.mxu1 }
 0x16c   : > { %1365 = vst [vmem:[%s2404_s19 + $0x88] sm:$0xff] %v1190_v31  ;;  %v1799_v35 = vadd.f32 %v1798_v34, %v1797_v30  ;;  %v1688_v36 = vpop.f32.mrf.mxu0 }
 0x16d   : > { %v1800_v37 = vpop.f32.mrf.mxu1 }
 0x16e   : > { %v1195_v38 = vadd.f32 %v1799_v35, %v1687_v33  ;;  %v1689_v39 = vpop.f32.mrf.mxu0 }
 0x16f   : > { %v1690_v40 = vadd.f32 %v1689_v39, %v1688_v36  ;;  %v1801_v41 = vpop.f32.mrf.mxu1 }
 0x170   : > { %1366 = vst [vmem:[%s2404_s19 + $0x90] sm:$0xff] %v1195_v38  ;;  %v1802_v42 = vadd.f32 %v1801_v41, %v1800_v37  ;;  %v1691_v43 = vpop.f32.mrf.mxu0 }
 0x171   : > { %v1803_v44 = vpop.f32.mrf.mxu1 }
 0x172   : > { %v1198_v45 = vadd.f32 %v1802_v42, %v1690_v40  ;;  %v1692_v46 = vpop.f32.mrf.mxu0 }
 0x173   : > { %v1693_v47 = vadd.f32 %v1692_v46, %v1691_v43  ;;  %v1804_v48 = vpop.f32.mrf.mxu1 }
 0x174   : > { %1367 = vst [vmem:[%s2404_s19 + $0x98] sm:$0xff] %v1198_v45  ;;  %v1805_v49 = vadd.f32 %v1804_v48, %v1803_v44  ;;  %v1694_v50 = vpop.f32.mrf.mxu0 }
 0x175   : > { %v1806_v51 = vpop.f32.mrf.mxu1 }
 0x176   : > { %v1203_v52 = vadd.f32 %v1805_v49, %v1693_v47  ;;  %v1695_v53 = vpop.f32.mrf.mxu0 }
 0x177   : > { %v1696_v54 = vadd.f32 %v1695_v53, %v1694_v50  ;;  %v1807_v55 = vpop.f32.mrf.mxu1 }
 0x178   : > { %1368 = vst [vmem:[%s2404_s19 + $0xa0] sm:$0xff] %v1203_v52  ;;  %v1808_v56 = vadd.f32 %v1807_v55, %v1806_v51  ;;  %v1697_v57 = vpop.f32.mrf.mxu0 }
 0x179   : > { %v1809_v58 = vpop.f32.mrf.mxu1 }
 0x17a   : > { %v1206_v59 = vadd.f32 %v1808_v56, %v1696_v54  ;;  %v1698_v60 = vpop.f32.mrf.mxu0 }
 0x17b   : > { %v1699_v61 = vadd.f32 %v1698_v60, %v1697_v57  ;;  %v1810_v62 = vpop.f32.mrf.mxu1 }
 0x17c   : > { %1369 = vst [vmem:[%s2404_s19 + $0xa8] sm:$0xff] %v1206_v59  ;;  %v1811_v63 = vadd.f32 %v1810_v62, %v1809_v58  ;;  %v1700_v0 = vpop.f32.mrf.mxu0 }
 0x17d   : > { %v1812_v1 = vpop.f32.mrf.mxu1 }
 0x17e   : > { %v1211_v2 = vadd.f32 %v1811_v63, %v1699_v61  ;;  %v1701_v3 = vpop.f32.mrf.mxu0 }
 0x17f   : > { %v1702_v4 = vadd.f32 %v1701_v3, %v1700_v0  ;;  %v1813_v5 = vpop.f32.mrf.mxu1 }
 0x180   : > { %1370 = vst [vmem:[%s2404_s19 + $0xb0] sm:$0xff] %v1211_v2  ;;  %v1814_v6 = vadd.f32 %v1813_v5, %v1812_v1  ;;  %v1703_v7 = vpop.f32.mrf.mxu0 }
 0x181   : > { %v1815_v8 = vpop.f32.mrf.mxu1 }
 0x182   : > { %v1214_v9 = vadd.f32 %v1814_v6, %v1702_v4  ;;  %v1704_v10 = vpop.f32.mrf.mxu0 }
 0x183   : > { %v1705_v11 = vadd.f32 %v1704_v10, %v1703_v7  ;;  %v1816_v12 = vpop.f32.mrf.mxu1 }
 0x184   : > { %1371 = vst [vmem:[%s2404_s19 + $0xb8] sm:$0xff] %v1214_v9  ;;  %v1817_v13 = vadd.f32 %v1816_v12, %v1815_v8  ;;  %v1706_v14 = vpop.f32.mrf.mxu0 }
 0x185   : > { %v1818_v15 = vpop.f32.mrf.mxu1 }
 0x186   : > { %v1219_v16 = vadd.f32 %v1817_v13, %v1705_v11  ;;  %v1707_v17 = vpop.f32.mrf.mxu0 }
 0x187   : > { %v1708_v18 = vadd.f32 %v1707_v17, %v1706_v14  ;;  %v1819_v19 = vpop.f32.mrf.mxu1 }
 0x188   : > { %1372 = vst [vmem:[%s2404_s19 + $0xc0] sm:$0xff] %v1219_v16  ;;  %v1820_v20 = vadd.f32 %v1819_v19, %v1818_v15  ;;  %v1709_v21 = vpop.f32.mrf.mxu0 }
 0x189   : > { %v1821_v22 = vpop.f32.mrf.mxu1 }
 0x18a   : > { %v1222_v23 = vadd.f32 %v1820_v20, %v1708_v18  ;;  %v1710_v24 = vpop.f32.mrf.mxu0 }
 0x18b   : > { %v1711_v25 = vadd.f32 %v1710_v24, %v1709_v21  ;;  %v1822_v26 = vpop.f32.mrf.mxu1 }
 0x18c   : > { %1373 = vst [vmem:[%s2404_s19 + $0xc8] sm:$0xff] %v1222_v23  ;;  %v1823_v27 = vadd.f32 %v1822_v26, %v1821_v22  ;;  %v1712_v28 = vpop.f32.mrf.mxu0 }
 0x18d   : > { %v1824_v29 = vpop.f32.mrf.mxu1 }
 0x18e   : > { %v1227_v30 = vadd.f32 %v1823_v27, %v1711_v25  ;;  %v1713_v31 = vpop.f32.mrf.mxu0 }
 0x18f   : > { %v1714_v32 = vadd.f32 %v1713_v31, %v1712_v28  ;;  %v1825_v33 = vpop.f32.mrf.mxu1 }
 0x190   : > { %1374 = vst [vmem:[%s2404_s19 + $0xd0] sm:$0xff] %v1227_v30  ;;  %v1826_v34 = vadd.f32 %v1825_v33, %v1824_v29  ;;  %v1715_v35 = vpop.f32.mrf.mxu0 }
 0x191   : > { %v1827_v36 = vpop.f32.mrf.mxu1 }
 0x192   : > { %v1230_v37 = vadd.f32 %v1826_v34, %v1714_v32  ;;  %v1716_v38 = vpop.f32.mrf.mxu0 }
 0x193   : > { %v1717_v39 = vadd.f32 %v1716_v38, %v1715_v35  ;;  %v1828_v40 = vpop.f32.mrf.mxu1 }
 0x194   : > { %1375 = vst [vmem:[%s2404_s19 + $0xd8] sm:$0xff] %v1230_v37  ;;  %v1829_v41 = vadd.f32 %v1828_v40, %v1827_v36  ;;  %v1718_v42 = vpop.f32.mrf.mxu0 }
 0x195   : > { %v1830_v43 = vpop.f32.mrf.mxu1 }
 0x196   : > { %v1235_v44 = vadd.f32 %v1829_v41, %v1717_v39  ;;  %v1719_v45 = vpop.f32.mrf.mxu0 }
 0x197   : > { %v1720_v46 = vadd.f32 %v1719_v45, %v1718_v42  ;;  %v1831_v47 = vpop.f32.mrf.mxu1 }
 0x198   : > { %1376 = vst [vmem:[%s2404_s19 + $0xe0] sm:$0xff] %v1235_v44  ;;  %v1832_v48 = vadd.f32 %v1831_v47, %v1830_v43  ;;  %v1721_v49 = vpop.f32.mrf.mxu0 }
 0x199   : > { %v1833_v50 = vpop.f32.mrf.mxu1 }
 0x19a   : > { %v1238_v51 = vadd.f32 %v1832_v48, %v1720_v46  ;;  %v1722_v52 = vpop.f32.mrf.mxu0 }
 0x19b   : > { %v1723_v53 = vadd.f32 %v1722_v52, %v1721_v49  ;;  %v1834_v54 = vpop.f32.mrf.mxu1 }
 0x19c   : > { %1377 = vst [vmem:[%s2404_s19 + $0xe8] sm:$0xff] %v1238_v51  ;;  %v1835_v55 = vadd.f32 %v1834_v54, %v1833_v50  ;;  %v1724_v56 = vpop.f32.mrf.mxu0 }
 0x19d   : > { %v1836_v57 = vpop.f32.mrf.mxu1 }
 0x19e   : > { %v1243_v58 = vadd.f32 %v1835_v55, %v1723_v53  ;;  %v1725_v59 = vpop.f32.mrf.mxu0 }
 0x19f   : > { %v1726_v60 = vadd.f32 %v1725_v59, %v1724_v56  ;;  %v1837_v61 = vpop.f32.mrf.mxu1 }
 0x1a0   : > { %1378 = vst [vmem:[%s2404_s19 + $0xf0] sm:$0xff] %v1243_v58  ;;  %v1838_v62 = vadd.f32 %v1837_v61, %v1836_v57 }
 0x1a2   : > { %v1246_v63 = vadd.f32 %v1838_v62, %v1726_v60 }
 0x1a4   : > { %1379 = vst [vmem:[%s2404_s19 + $0xf8] sm:$0xff] %v1246_v63 }
 0x1a5   : > { %2113 = shalt.err (!%p2110_p5)
}
 0x1a6   : > { %s2114_s6 = scalar_lea.hbm %s2442_s18, 4096  ;;  %s2118_s16 = scalar_lea.hbm %s2495_s2, 8192 }
 0x1a7   : > { %p2115_p7 = scmp.ne.s32.totalorder %s2442_s18, %s2114_s6  ;;  %p2119_p9 = scmp.lt.s32.totalorder %s2442_s18, %s2495_s2 }
 0x1a8   : > { %p2120_p11 = scmp.lt.s32.totalorder %s2118_s16, %s2114_s6 }
 0x1a9   : > { %p2116_p6 = pnand %p2115_p7, %p2297_p13 }
 0x1aa   : > { %p2121_p12 = por %p2120_p11, %p2119_p9 }
 0x1ab   : > { %p2117_p4 = pneg %p2116_p6 }
 0x1ad   : > { %p2122_p1 = pnand %p2121_p12, %p2117_p4 }
 0x1af   : > { %2125 = shalt.err (!%p2122_p1)
}
 0x1b0   : > { %s2193_s17 = smov 128   ;;  %s2194_s19 = smov 8  }
 0x1b1   : > { %1845 = dma.vmem_to_hbm [thread:$0]  (%p2297_p13), %s2444_s24, 4096, %s2442_s18, %s1381_s28, %s2193_s17, %s2193_s17, %s2194_s19  }
 0x1b2 PF: > { %s1410_s21 = sand.u32 1, %s2164_s9   ;;  %p2507_p8 = scmp.ne.s32.totalorder %s2500_s20, 0 }
 0x1b3   : > { %p2508_p10 = scmp.ge.s32.totalorder %s2184_s14, 2  ;;  %s1411_s26 = scalar_lea.sflag [#allocation5], %s1410_s21 }
 0x1b5   : > { %p1856_p0 = pnand %p2508_p10, %p2507_p8 }
 0x1b7   : > { %p1857_p2 = pneg %p1856_p0 }
 0x1b9   : > { %2159 = dma.done.wait (%p1857_p2), %s1411_s26, 4096  }
 0x1ba   : > { %2161 = vsyncadd (%p1857_p2), %s1411_s26, 4294963200  ;;  %s19_s14 = sadd.s32 1, %s2184_s14   ;;  %s2509_s9 = smov %s2168_s10 }
 0x1bb   : > { %p16_p3 = scmp.ge.s32.totalorder %s19_s14, 4   ;;  %s2510_s10 = smov %s2172_s11 }
 0x1bc   : > { %s2511_s11 = smov %s2306_s15  ;;  %s2512_s12 = smov %s2180_s13 }
 0x1bd   : > { %s2513_s13 = smov %s2515_s25  ;;  %18 = sbr.rel (!%p16_p3) target bundleno = 7 (0x7), region = 86 }
 0x1c2   :  { %1416 = vsyncpa [#allocation4], 1 }
 0x1c3   :  { %1418 = vsyncpa [#allocation4 + $0x1], 1 }
 0x1c4   :  { %1419 = vsyncpa [#allocation7], 1 }
 0x1c5   :  { %1420 = vsyncpa [#allocation5], 1 }
 0x1c6   :  { %1422 = vsyncpa [#allocation5 + $0x1], 1 }

</bundles_post_ra>
